<compile_context>
chip_gen: v7x
topology: tpu7x:2x2x1
jax: 0.10.0
libtpu: 0.0.40
codegen_flags: <defaults>
</compile_context>

<pallas_src>
import jax
import jax.numpy as jnp
from jax.experimental import pallas as pl
from jax.experimental.pallas import tpu as pltpu


def _round_up(n, m):
    return ((n + m - 1) // m) * m


def _sigmoid_via_tanh(x):
    # sigmoid(x) == 0.5 * (1 + tanh(x/2)); keeps the nonlinearity on the EUP
    # slot (no VALU divide from an exp-based lowering).
    return 0.5 * (1.0 + jnp.tanh(0.5 * x))


# --------------------------------------------------------------------------
# Kernel factory: one grid step runs T_CHUNK GRU steps.  H lives in the output
# ref, which is VMEM-resident across the whole "arbitrary" time axis.
# Inputs per grid step:
#   gx_ref   : (T_CHUNK, b_blk, 3*E_pad) f32  -- precomputed x-projection + bias
#   h0_ref   : (b_blk, E_pad)            f32
#   whrz_ref : (E_pad, 2*E_pad)          mm dtype (bf16 by default)
#   whh_ref  : (E_pad, E_pad)            mm dtype
#   h_ref    : (b_blk, E_pad)            f32 output / state accumulator
# --------------------------------------------------------------------------
def make_gru_chunk_kernel(t_total, t_chunk):
    mask_needed = (t_total % t_chunk) != 0

    def kernel(gx_ref, h0_ref, whrz_ref, whh_ref, h_ref):
        tc = pl.program_id(1)

        @pl.when(tc == 0)
        def _():
            h_ref[...] = h0_ref[...]

        e = h_ref.shape[-1]          # padded embedding dim (multiple of 128)
        mm = whrz_ref.dtype          # matmul operand dtype (bf16 or f32)

        def step(tt, h):
            gx = gx_ref[tt]                           # (b_blk, 3*E_pad) f32
            h_mm = h.astype(mm)                       # single cast, reused

            # Fused hidden projection for the R and Z gates: (b_blk, 2*E_pad).
            rz = gx[:, : 2 * e] + jnp.dot(
                h_mm, whrz_ref[...], preferred_element_type=jnp.float32)
            r = _sigmoid_via_tanh(rz[:, :e])
            z = _sigmoid_via_tanh(rz[:, e:])

            # Candidate state from the reset-gated hidden.
            ht_pre = gx[:, 2 * e:] + jnp.dot(
                (r * h).astype(mm), whh_ref[...],
                preferred_element_type=jnp.float32)
            h_tilde = jnp.tanh(ht_pre)

            h_new = z * h + (1.0 - z) * h_tilde
            if mask_needed:
                # Skip padded timesteps past the real sequence length.
                valid = (tc * t_chunk + tt) < t_total
                h_new = jnp.where(valid, h_new, h)
            return h_new

        h_ref[...] = jax.lax.fori_loop(0, t_chunk, step, h_ref[...],
                                       unroll=True)

    return kernel


# --------------------------------------------------------------------------
# One-time parameter preparation (hoisted out of the forward path).
# --------------------------------------------------------------------------
def prepare_params(params, *, mm_dtype=jnp.bfloat16):
    """Split, transpose, pack and lane-pad PyTorch-layout GRU weights.

    params: dict with R_w/Z_w/H_w of shape (E, 2E) and R_b/Z_b/H_b of shape (E,).
    mm_dtype: MXU operand dtype; bf16 by default (v5e/v6e/v7x MXUs are all
              bf16-native), f32 still supported for strict-accuracy checks.
    """
    E = params["R_b"].shape[0]
    E_pad = _round_up(E, 128)

    def split_pad(w):
        # Linear(concat([a, b])) == a @ W[:, :E].T + b @ W[:, E:].T + bias
        wx = jnp.zeros((E_pad, E_pad), jnp.float32).at[:E, :E].set(
            jnp.asarray(w[:, :E], jnp.float32).T)
        wh = jnp.zeros((E_pad, E_pad), jnp.float32).at[:E, :E].set(
            jnp.asarray(w[:, E:], jnp.float32).T)
        return wx, wh

    wrx, wrh = split_pad(params["R_w"])
    wzx, wzh = split_pad(params["Z_w"])
    whx, whh = split_pad(params["H_w"])

    def pad_b(b):
        return jnp.zeros((E_pad,), jnp.float32).at[:E].set(
            jnp.asarray(b, jnp.float32))

    return {
        "E": E,
        "E_pad": E_pad,
        # x-side projection for all three gates; used once per sequence,
        # outside the recurrence:
        "Wx_all": jnp.concatenate([wrx, wzx, whx], axis=1).astype(mm_dtype),
        # h-side projections; resident inside the recurrent kernel:
        "Wh_rz": jnp.concatenate([wrh, wzh], axis=1).astype(mm_dtype),
        "Whh": whh.astype(mm_dtype),
        # biases (f32), folded into the precomputed gx:
        "b_all": jnp.concatenate(
            [pad_b(params["R_b"]), pad_b(params["Z_b"]), pad_b(params["H_b"])]
        ).reshape(1, 3 * E_pad),
    }


def check_padding_invariant(prepared):
    """Padded weight rows/cols and bias lanes MUST be exactly zero so padded H
    lanes stay 0 through the recurrence (z=0.5, h_tilde=tanh(0)=0)."""
    E, E_pad = prepared["E"], prepared["E_pad"]
    if E == E_pad:
        return
    wx = prepared["Wx_all"].astype(jnp.float32)
    whrz = prepared["Wh_rz"].astype(jnp.float32)
    whh = prepared["Whh"].astype(jnp.float32)
    b = prepared["b_all"][0]
    ok = True
    ok &= bool(jnp.all(wx[E:, :] == 0))
    ok &= bool(jnp.all(whrz[E:, :] == 0))
    ok &= bool(jnp.all(whh[E:, :] == 0))
    for k in range(3):
        ok &= bool(jnp.all(wx[:, k * E_pad + E:(k + 1) * E_pad] == 0))
        ok &= bool(jnp.all(b[k * E_pad + E:(k + 1) * E_pad] == 0))
    for k in range(2):
        ok &= bool(jnp.all(whrz[:, k * E_pad + E:(k + 1) * E_pad] == 0))
    ok &= bool(jnp.all(whh[:, E:] == 0))
    assert ok, "padding invariant violated: padded weight/bias lanes must be 0"


# --------------------------------------------------------------------------
# Batched, multi-timestep forward: T GRU steps inside a single pallas_call.
# --------------------------------------------------------------------------
def gru_sequence_forward(xs, h0, prepared, *, t_chunk=8):
    """xs: (T, B, E) inputs; h0: (B, E) initial hidden.  Returns H_T: (B, E)."""
    E, E_pad = prepared["E"], prepared["E_pad"]
    T, B, _ = xs.shape
    mm = prepared["Wx_all"].dtype

    # --- batch padding / block choice ------------------------------------
    # n_b >= 2 whenever B_pad >= 16 so the "parallel" batch axis can shard
    # across v7x's two TensorCores (no-op on single-TC v5e/v6e).
    B_pad = _round_up(max(B, 1), 8)
    if B_pad >= 16:
        b_blk = min(256, _round_up((B_pad + 1) // 2, 8))
    else:
        b_blk = B_pad
    B_pad = _round_up(B_pad, b_blk)
    n_b = B_pad // b_blk

    # --- time chunking ----------------------------------------------------
    T_CHUNK = min(T, t_chunk)
    T_pad = _round_up(T, T_CHUNK)
    n_t = T_pad // T_CHUNK

    xs_p = jnp.zeros((T_pad, B_pad, E_pad), jnp.float32).at[:T, :B, :E].set(
        xs.astype(jnp.float32))
    h0_p = jnp.zeros((B_pad, E_pad), jnp.float32).at[:B, :E].set(
        h0.astype(jnp.float32))

    # --- hoisted, time-invariant input projection (plain XLA, one big MXU
    # matmul with M = T_pad*B_pad) + biases folded in --------------------
    gx = (jnp.dot(xs_p.reshape(T_pad * B_pad, E_pad).astype(mm),
                  prepared["Wx_all"],
                  preferred_element_type=jnp.float32)
          + prepared["b_all"]).reshape(T_pad, B_pad, 3 * E_pad)

    whrz, whh = prepared["Wh_rz"], prepared["Whh"]
    w_itemsize = jnp.dtype(whrz.dtype).itemsize

    # --- VMEM budget (explicit: v5e default scoped limit is only 16 MiB;
    # v7x physical ceiling is 64 MiB) --------------------------------------
    est = (2 * (whrz.size + whh.size) * w_itemsize       # weights (safe x2)
           + 2 * T_CHUNK * b_blk * 3 * E_pad * 4          # gx, double-buffered
           + 4 * b_blk * E_pad * 4)                       # h0 + output state
    vmem_limit = int(min(64 * 2**20, max(32 * 2**20, 2 * est)))

    # Advisory only; uses padded dims (overstates for small E/B).
    cost = pl.CostEstimate(
        flops=2 * T * B_pad * E_pad * 3 * E_pad,          # two h-side matmuls
        transcendentals=3 * T * B_pad * E_pad,            # 3 tanh per element
        bytes_accessed=(gx.size + 2 * h0_p.size) * 4
        + (whrz.size + whh.size) * w_itemsize,
    )

    kernel = make_gru_chunk_kernel(T, T_CHUNK)

    h_out = pl.pallas_call(
        kernel,
        out_shape=jax.ShapeDtypeStruct((B_pad, E_pad), jnp.float32),
        grid_spec=pltpu.PrefetchScalarGridSpec(
            num_scalar_prefetch=0,
            grid=(n_b, n_t),
            in_specs=[
                # Precomputed gate inputs for T_CHUNK steps.
                pl.BlockSpec((T_CHUNK, b_blk, 3 * E_pad),
                             lambda b, t: (t, b, 0)),
                # Initial hidden state.
                pl.BlockSpec((b_blk, E_pad), lambda b, t: (b, 0)),
                # Resident hidden weights: constant index_map -> single buffer.
                pl.BlockSpec((E_pad, 2 * E_pad), lambda b, t: (0, 0),
                             pipeline_mode=pl.Buffered(1)),
                pl.BlockSpec((E_pad, E_pad), lambda b, t: (0, 0),
                             pipeline_mode=pl.Buffered(1)),
            ],
            # H accumulator: constant block index along the time axis.
            out_specs=pl.BlockSpec((b_blk, E_pad), lambda b, t: (b, 0)),
        ),
        compiler_params=pltpu.CompilerParams(
            dimension_semantics=("parallel", "arbitrary"),
            vmem_limit_bytes=vmem_limit,
        ),
        cost_estimate=cost,
    )(gx, h0_p, whrz, whh)

    return h_out[:B, :E]


def gru_forward(x, H, prepared):
    """Single GRU cell step (exact GRUNet.forward semantics): x, H are (E,)."""
    E = prepared["E"]
    h_new = gru_sequence_forward(x.reshape(1, 1, E), H.reshape(1, E), prepared)
    return h_new.reshape(E)


# --------------------------------------------------------------------------
# Pure-JAX references mirroring the PyTorch forward.
# --------------------------------------------------------------------------
def _reference(x, H, params):
    xh = jnp.concatenate([x, H])
    R = jax.nn.sigmoid(params["R_w"] @ xh + params["R_b"])
    Z = jax.nn.sigmoid(params["Z_w"] @ xh + params["Z_b"])
    xrh = jnp.concatenate([x, R * H])
    H_tilde = jnp.tanh(params["H_w"] @ xrh + params["H_b"])
    return Z * H + (1.0 - Z) * H_tilde


def _reference_seq(xs, h0, params):
    cell = jax.vmap(lambda xi, hi: _reference(xi, hi, params))

    def step(h, x):
        return cell(x, h), None

    h_final, _ = jax.lax.scan(step, h0, xs)
    return h_final


def init_params(key, embedding_dim):
    """Matches nn.Linear default init: U(-1/sqrt(in_features), 1/sqrt(in_features))."""
    E = embedding_dim
    in_f = 2 * E
    bound = 1.0 / jnp.sqrt(jnp.float32(in_f))
    keys = jax.random.split(key, 6)

    def u(k, shape):
        return jax.random.uniform(k, shape, jnp.float32, -bound, bound)

    return {
        "R_w": u(keys[0], (E, in_f)), "R_b": u(keys[1], (E,)),
        "Z_w": u(keys[2], (E, in_f)), "Z_b": u(keys[3], (E,)),
        "H_w": u(keys[4], (E, in_f)), "H_b": u(keys[5], (E,)),
    }


if __name__ == "__main__":
    E = 32   # embedding_dim (as in the PyTorch module)
    B = 4    # independent GRU cells batched together
    T = 8    # recurrent timesteps executed inside ONE pallas_call

    key = jax.random.PRNGKey(0)
    kp, kx, kh, kxs, kh0 = jax.random.split(key, 5)

    params = init_params(kp, E)
    prepared_bf16 = prepare_params(params)                           # default: bf16 MXU operands
    prepared_f32 = prepare_params(params, mm_dtype=jnp.float32)      # strict-accuracy check path
    check_padding_invariant(prepared_bf16)
    check_padding_invariant(prepared_f32)

    # --- single-step check: exactly the PyTorch module's forward(x, H) ---
    x = jax.random.normal(kx, (E,), jnp.float32)
    H = jax.random.normal(kh, (E,), jnp.float32)
    ref = _reference(x, H, params)
    out_f32 = jax.block_until_ready(gru_forward(x, H, prepared_f32))
    out_bf16 = jax.block_until_ready(gru_forward(x, H, prepared_bf16))
    assert out_f32.shape == (E,)
    assert jnp.allclose(out_f32, ref, atol=1e-4, rtol=1e-4), "single-step (f32) mismatch"
    assert jnp.allclose(out_bf16, ref, atol=3e-2, rtol=3e-2), "single-step (bf16) mismatch"

    # --- batched recurrence: T steps with H and weights VMEM-resident ---
    xs = jax.random.normal(kxs, (T, B, E), jnp.float32)
    h0 = jax.random.normal(kh0, (B, E), jnp.float32)
    h_ref = _reference_seq(xs, h0, params)
    h_f32 = jax.block_until_ready(gru_sequence_forward(xs, h0, prepared_f32))
    h_bf16 = jax.block_until_ready(gru_sequence_forward(xs, h0, prepared_bf16))
    assert h_f32.shape == (B, E)
    assert jnp.allclose(h_f32, h_ref, atol=1e-4, rtol=1e-4), "sequence (f32) mismatch"
    assert jnp.allclose(h_bf16, h_ref, atol=5e-2, rtol=5e-2), "sequence (bf16) mismatch"

    # --- longer, non-chunk-aligned sequence: exercises the T-mask path and
    #     bounds bf16 recurrent-state drift at a more realistic T ---
    T2 = 33
    xs2 = jax.random.normal(jax.random.fold_in(kxs, 1), (T2, B, E), jnp.float32)
    h2_ref = _reference_seq(xs2, h0, params)
    h2_f32 = jax.block_until_ready(gru_sequence_forward(xs2, h0, prepared_f32))
    h2_bf16 = jax.block_until_ready(gru_sequence_forward(xs2, h0, prepared_bf16))
    assert jnp.allclose(h2_f32, h2_ref, atol=1e-4, rtol=1e-4), "masked-T (f32) mismatch"
    assert jnp.allclose(h2_bf16, h2_ref, atol=2e-1, rtol=2e-1), "bf16 drift bound exceeded"

    print("KERNEL_OK")
</pallas_src>

<mosaic_0001>
module attributes {stable_mosaic.version = 11 : i64} {
  func.func @kernel(%arg0: i32, %arg1: i32, %arg2: memref<1x8x384xf32, #tpu.memory_space<vmem>>, %arg3: memref<8x128xf32, #tpu.memory_space<vmem>>, %arg4: memref<128x256xf32, #tpu.memory_space<vmem>>, %arg5: memref<128x128xf32, #tpu.memory_space<vmem>>, %arg6: memref<8x128xf32, #tpu.memory_space<vmem>>) attributes {dimension_semantics = [#tpu.dimension_semantics<parallel>, #tpu.dimension_semantics<arbitrary>], iteration_bounds = array<i64: 1, 1>, scalar_prefetch = 0 : i64, scratch_operands = 0 : i64, tpu.core_type = #tpu.core_type<tc>, window_params = [{transform_indices = @transform_0, window_bounds = array<i64: 1, 8, 384>}, {transform_indices = @transform_1, window_bounds = array<i64: 8, 128>}, {pipeline_mode = #tpu.pipeline_mode<synchronous>, transform_indices = @transform_2, window_bounds = array<i64: 128, 256>}, {pipeline_mode = #tpu.pipeline_mode<synchronous>, transform_indices = @transform_3, window_bounds = array<i64: 128, 128>}, {transform_indices = @transform_4, window_bounds = array<i64: 8, 128>}]} {
    %c0_i32 = arith.constant 0 : i32
    %0 = arith.cmpi eq, %arg1, %c0_i32 : i32
    %1 = arith.extui %0 : i1 to i32
    %c0_i32_0 = arith.constant 0 : i32
    %2 = arith.cmpi ne, %1, %c0_i32_0 : i32
    scf.if %2 {
      %c0_19 = arith.constant 0 : index
      %c0_20 = arith.constant 0 : index
      %39 = vector.load %arg3[%c0_19, %c0_20] : memref<8x128xf32, #tpu.memory_space<vmem>>, vector<8x128xf32>
      %c0_21 = arith.constant 0 : index
      %c0_22 = arith.constant 0 : index
      %40 = vector.load %arg6[%c0_21, %c0_22] : memref<8x128xf32, #tpu.memory_space<vmem>>, vector<8x128xf32>
      tpu.vector_store %arg6[%c0_21, %c0_22], %39 {strides = array<i32>} : memref<8x128xf32, #tpu.memory_space<vmem>>, vector<8x128xf32>,
    } else {
    }
    %c0 = arith.constant 0 : index
    %c0_1 = arith.constant 0 : index
    %3 = vector.load %arg6[%c0, %c0_1] : memref<8x128xf32, #tpu.memory_space<vmem>>, vector<8x128xf32>
    %c0_i32_2 = arith.constant 0 : i32
    %4 = arith.index_cast %c0_i32_2 : i32 to index
    %c0_3 = arith.constant 0 : index
    %c0_4 = arith.constant 0 : index
    %5 = vector.load %arg2[%4, %c0_3, %c0_4] : memref<1x8x384xf32, #tpu.memory_space<vmem>>, vector<1x8x384xf32>
    %6 = vector.shape_cast %5 : vector<1x8x384xf32> to vector<8x384xf32>
    %7 = vector.extract_strided_slice %6 {offsets = [0, 0], sizes = [8, 256], strides = [1, 1]} : vector<8x384xf32> to vector<8x256xf32>
    %c0_5 = arith.constant 0 : index
    %c0_6 = arith.constant 0 : index
    %8 = vector.load %arg4[%c0_5, %c0_6] : memref<128x256xf32, #tpu.memory_space<vmem>>, vector<128x256xf32>
    %cst = arith.constant dense<0.000000e+00> : vector<8x256xf32>
    %9 = tpu.matmul %3, %8, %cst {dimension_numbers = #tpu.dot_dimension_numbers<[1], [0], [0], [1], [0, 0, 1, 1], [], []>} : vector<8x128xf32>, vector<128x256xf32>, vector<8x256xf32> -> vector<8x256xf32>
    %10 = arith.addf %7, %9 : vector<8x256xf32>
    %11 = vector.extract_strided_slice %10 {offsets = [0, 0], sizes = [8, 128], strides = [1, 1]} : vector<8x256xf32> to vector<8x128xf32>
    %cst_7 = arith.constant 5.000000e-01 : f32
    %12 = vector.broadcast %cst_7 : f32 to vector<8x128xf32>
    %13 = arith.mulf %12, %11 : vector<8x128xf32>
    %14 = math.tanh %13 : vector<8x128xf32>
    %cst_8 = arith.constant 1.000000e+00 : f32
    %15 = vector.broadcast %cst_8 : f32 to vector<8x128xf32>
    %16 = arith.addf %15, %14 : vector<8x128xf32>
    %cst_9 = arith.constant 5.000000e-01 : f32
    %17 = vector.broadcast %cst_9 : f32 to vector<8x128xf32>
    %18 = arith.mulf %17, %16 : vector<8x128xf32>
    %19 = vector.extract_strided_slice %10 {offsets = [0, 128], sizes = [8, 128], strides = [1, 1]} : vector<8x256xf32> to vector<8x128xf32>
    %cst_10 = arith.constant 5.000000e-01 : f32
    %20 = vector.broadcast %cst_10 : f32 to vector<8x128xf32>
    %21 = arith.mulf %20, %19 : vector<8x128xf32>
    %22 = math.tanh %21 : vector<8x128xf32>
    %cst_11 = arith.constant 1.000000e+00 : f32
    %23 = vector.broadcast %cst_11 : f32 to vector<8x128xf32>
    %24 = arith.addf %23, %22 : vector<8x128xf32>
    %cst_12 = arith.constant 5.000000e-01 : f32
    %25 = vector.broadcast %cst_12 : f32 to vector<8x128xf32>
    %26 = arith.mulf %25, %24 : vector<8x128xf32>
    %27 = vector.extract_strided_slice %6 {offsets = [0, 256], sizes = [8, 128], strides = [1, 1]} : vector<8x384xf32> to vector<8x128xf32>
    %28 = arith.mulf %18, %3 : vector<8x128xf32>
    %c0_13 = arith.constant 0 : index
    %c0_14 = arith.constant 0 : index
    %29 = vector.load %arg5[%c0_13, %c0_14] : memref<128x128xf32, #tpu.memory_space<vmem>>, vector<128x128xf32>
    %cst_15 = arith.constant dense<0.000000e+00> : vector<8x128xf32>
    %30 = tpu.matmul %28, %29, %cst_15 {dimension_numbers = #tpu.dot_dimension_numbers<[1], [0], [0], [1], [0, 0, 1, 1], [], []>} : vector<8x128xf32>, vector<128x128xf32>, vector<8x128xf32> -> vector<8x128xf32>
    %31 = arith.addf %27, %30 : vector<8x128xf32>
    %32 = math.tanh %31 : vector<8x128xf32>
    %33 = arith.mulf %26, %3 : vector<8x128xf32>
    %cst_16 = arith.constant 1.000000e+00 : f32
    %34 = vector.broadcast %cst_16 : f32 to vector<8x128xf32>
    %35 = arith.subf %34, %26 : vector<8x128xf32>
    %36 = arith.mulf %35, %32 : vector<8x128xf32>
    %37 = arith.addf %33, %36 : vector<8x128xf32>
    %c1_i32 = arith.constant 1 : i32
    %c0_17 = arith.constant 0 : index
    %c0_18 = arith.constant 0 : index
    %38 = vector.load %arg6[%c0_17, %c0_18] : memref<8x128xf32, #tpu.memory_space<vmem>>, vector<8x128xf32>
    tpu.vector_store %arg6[%c0_17, %c0_18], %37 {strides = array<i32>} : memref<8x128xf32, #tpu.memory_space<vmem>>, vector<8x128xf32>,
    return
  }
  func.func @transform_0(%arg0: i32, %arg1: i32) -> (i32, i32, i32) {
    %c0_i32 = arith.constant 0 : i32
    %c0_i32_0 = arith.constant 0 : i32
    return %arg1, %arg0, %c0_i32 : i32, i32, i32
  }
  func.func @transform_1(%arg0: i32, %arg1: i32) -> (i32, i32) {
    %c0_i32 = arith.constant 0 : i32
    %c0_i32_0 = arith.constant 0 : i32
    return %arg0, %c0_i32 : i32, i32
  }
  func.func @transform_2(%arg0: i32, %arg1: i32) -> (i32, i32) {
    %c0_i32 = arith.constant 0 : i32
    %c0_i32_0 = arith.constant 0 : i32
    %c0_i32_1 = arith.constant 0 : i32
    return %c0_i32, %c0_i32_0 : i32, i32
  }
  func.func @transform_3(%arg0: i32, %arg1: i32) -> (i32, i32) {
    %c0_i32 = arith.constant 0 : i32
    %c0_i32_0 = arith.constant 0 : i32
    %c0_i32_1 = arith.constant 0 : i32
    return %c0_i32, %c0_i32_0 : i32, i32
  }
  func.func @transform_4(%arg0: i32, %arg1: i32) -> (i32, i32) {
    %c0_i32 = arith.constant 0 : i32
    %c0_i32_0 = arith.constant 0 : i32
    return %arg0, %c0_i32 : i32, i32
  }
}

</mosaic_0001>

<bundles_post_ra>
// kernel: tpu_custom_call.1
= control target key start
LH: loop header
LB: loop body
LE: loop exit
PB: predicated region body
PF: predicated region fallthrough
CT: control target
= control target key end

     0   :  { %9 = vsyncpa [#allocation3], 0  ;;  %s654_s0 = inlined_call_operand.hbm [shape: f32[1,8,384], index: 0, kind: input, shape index: {}]   ;;  %s655_s1 = inlined_call_operand.hbm [shape: f32[8,128], index: 1, kind: input, shape index: {}]   ;;  %s656_s2 = inlined_call_operand.hbm [shape: f32[128,256], index: 2, kind: input, shape index: {}]   ;;  %s657_s3 = inlined_call_operand.hbm [shape: f32[128,128], index: 3, kind: input, shape index: {}]   ;;  %s658_s4 = inlined_call_operand.hbm [shape: f32[8,128], index: 4, kind: output, shape index: {}]  }
   0x1   :  { %10 = vsyncpa [#allocation6], 0 }
   0x2   :  { %11 = vsyncpa [#allocation9], 0 }
   0x3   :  { %12 = vsyncpa [#allocation4], 0  ;;  %s547_s15 = smov [#allocation5]   ;;  %s548_s17 = smov [#allocation2]  }
   0x4   :  { %s29_s16 = sshll.u32 %s547_s15, 4  ;;  %s19_s18 = sshll.u32 %s548_s17, 4  ;;  %s30_s16 = int_to_ptr.vmem [resolvable:$true] %s29_s16  ;;  %s20_s18 = int_to_ptr.vmem [resolvable:$true] %s19_s18 }
   0x5   :  { %s429_s21 = scalar_lea.hbm %s655_s1, 128 }
   0x6   :  { %p430_p0 = scmp.ne.s32.totalorder %s655_s1, %s429_s21  ;;  %p433_p1 = scmp.lt.u32.totalorder %s429_s21, %s655_s1 }
   0x8   :  { %p435_p2 = pnand %p433_p1, %p430_p0 }
   0xa   :  { %438 = shalt.err (!%p435_p2)
}
   0xb   :  { %s439_s26 = scalar_lea.vmem %s30_s16, 128  ;;  %p444_p4 = scmp.lt.s32.totalorder %s30_s16, %s30_s16 }
   0xc   :  { %p440_p3 = scmp.ne.s32.totalorder %s30_s16, %s439_s26  ;;  %p445_p5 = scmp.lt.s32.totalorder %s439_s26, %s439_s26 }
   0xe   :  { %p446_p6 = por %p445_p5, %p444_p4 }
  0x10   :  { %p447_p7 = pnand %p446_p6, %p440_p3 }
  0x12   :  { %450 = shalt.err (!%p447_p7)
}
  0x13   :  { %32 = dma.hbm_to_vmem [thread:$0]  %s655_s1, 128, %s30_s16, [#allocation6]  }
  0x14   :  { %s451_s5 = scalar_lea.hbm %s654_s0, 384 }
  0x15   :  { %p452_p8 = scmp.ne.s32.totalorder %s654_s0, %s451_s5  ;;  %p455_p9 = scmp.lt.u32.totalorder %s451_s5, %s654_s0 }
  0x17   :  { %p457_p10 = pnand %p455_p9, %p452_p8 }
  0x19   :  { %460 = shalt.err (!%p457_p10)
}
  0x1a   :  { %s461_s10 = scalar_lea.vmem %s20_s18, 384  ;;  %p466_p12 = scmp.lt.s32.totalorder %s20_s18, %s20_s18 }
  0x1b   :  { %p462_p11 = scmp.ne.s32.totalorder %s20_s18, %s461_s10  ;;  %p467_p13 = scmp.lt.s32.totalorder %s461_s10, %s461_s10 }
  0x1d   :  { %p468_p0 = por %p467_p13, %p466_p12 }
  0x1f   :  { %p469_p1 = pnand %p468_p0, %p462_p11 }
  0x21   :  { %472 = shalt.err (!%p469_p1)
}
  0x22   :  { %22 = dma.hbm_to_vmem [thread:$0]  %s654_s0, 384, %s20_s18, [#allocation3]  }
  0x23   :  { %s549_s12 = smov [#allocation7]   ;;  %s473_s16 = scalar_lea.hbm %s656_s2, 4096 }
  0x24   :  { %s38_s13 = sshll.u32 %s549_s12, 4  ;;  %p474_p2 = scmp.ne.s32.totalorder %s656_s2, %s473_s16  ;;  %s39_s13 = int_to_ptr.vmem [resolvable:$true] %s38_s13 }
  0x25   :  { %p477_p3 = scmp.lt.u32.totalorder %s473_s16, %s656_s2 }
  0x27   :  { %p479_p4 = pnand %p477_p3, %p474_p2 }
  0x29   :  { %482 = shalt.err (!%p479_p4)
}
  0x2a   :  { %s483_s22 = scalar_lea.vmem %s39_s13, 4096  ;;  %p488_p6 = scmp.lt.s32.totalorder %s39_s13, %s39_s13 }
  0x2b   :  { %p484_p5 = scmp.ne.s32.totalorder %s39_s13, %s483_s22  ;;  %p489_p7 = scmp.lt.s32.totalorder %s483_s22, %s483_s22 }
  0x2d   :  { %p490_p8 = por %p489_p7, %p488_p6 }
  0x2f   :  { %p491_p9 = pnand %p490_p8, %p484_p5 }
  0x31   :  { %494 = shalt.err (!%p491_p9)
}
  0x32   :  { %s550_s0 = smov 256   ;;  %s551_s18 = smov 16  }
  0x33   :  { %44 = dma.hbm_to_vmem [thread:$0]  %s656_s2, 4096, %s39_s13, [#allocation6], %s550_s0, %s550_s0, %s551_s18  }
  0x34   :  { %s552_s25 = smov [#allocation8]   ;;  %s495_s29 = scalar_lea.hbm %s657_s3, 2048 }
  0x35   :  { %s50_s26 = sshll.u32 %s552_s25, 4  ;;  %p496_p10 = scmp.ne.s32.totalorder %s657_s3, %s495_s29  ;;  %s51_s26 = int_to_ptr.vmem [resolvable:$true] %s50_s26 }
  0x36   :  { %p499_p11 = scmp.lt.u32.totalorder %s495_s29, %s657_s3 }
  0x38   :  { %p501_p12 = pnand %p499_p11, %p496_p10 }
  0x3a   :  { %504 = shalt.err (!%p501_p12)
}
  0x3b   :  { %s505_s8 = scalar_lea.vmem %s51_s26, 2048  ;;  %p510_p0 = scmp.lt.s32.totalorder %s51_s26, %s51_s26 }
  0x3c   :  { %p506_p13 = scmp.ne.s32.totalorder %s51_s26, %s505_s8  ;;  %p511_p1 = scmp.lt.s32.totalorder %s505_s8, %s505_s8 }
  0x3e   :  { %p512_p2 = por %p511_p1, %p510_p0 }
  0x40   :  { %p513_p3 = pnand %p512_p2, %p506_p13 }
  0x42   :  { %516 = shalt.err (!%p513_p3)
}
  0x43   :  { %s553_s2 = smov 128   ;;  %s554_s9 = smov 8  }
  0x44   :  { %56 = dma.hbm_to_vmem [thread:$0]  %s657_s3, 2048, %s51_s26, [#allocation9], %s553_s2, %s553_s2, %s554_s9  }
  0x45   :  { %539 = dma.done.wait [#allocation3], 384  }
  0x46   :  { %540 = vsyncadd [#allocation3], 4294966912 }
  0x47   :  { %541 = dma.done.wait [#allocation6], 4224  }
  0x48   :  { %542 = vsyncadd [#allocation6], 4294963072 }
  0x49   :  { %543 = dma.done.wait [#allocation9], 2048  }
  0x4a   :  { %544 = vsyncadd [#allocation9], 4294965248  ;;  %v555_v0 = vmov 0.0   ;;  %v556_v1 = vmov 0.0|0.0   ;;  %v80_v2 = vld [vmem:[#allocation7 + $0x8] sm:$0xff]  ;;  %v82_v3 = vld [vmem:[#allocation7 + $0x18] sm:$0xff] }
  0x4b   :  { %175 = vmatprep.mubr.f32.mxu0 %v555_v0  ;;  %387 = vmatprep.subr.bf16.mxu1 %v556_v1  ;;  %v79_v4 = vld [vmem:[#allocation7] sm:$0xff]  ;;  %v355_v5 = vpack.c.bf16 %v82_v3, %v80_v2  ;;  %v81_v6 = vld [vmem:[#allocation7 + $0x10] sm:$0xff]  ;;  %v84_v7 = vld [vmem:[#allocation7 + $0x28] sm:$0xff]  ;;  %vm557_vm0 = vmmov 0   ;;  %s558_s3 = smov [#allocation10]  }
  0x4c   :  { %v86_v8 = vld [vmem:[#allocation7 + $0x38] sm:$0xff]  ;;  %v357_v9 = vpack.c.bf16 %v81_v6, %v79_v4  ;;  %v83_v11 = vld [vmem:[#allocation7 + $0x20] sm:$0xff]  ;;  %v85_v12 = vld [vmem:[#allocation7 + $0x30] sm:$0xff]  ;;  %352 = vmatprep.mubr.msk.f32.mxu1 %vm557_vm0, %v555_v0  ;;  %s292_s11 = sshll.u32 %s558_s3, 4  ;;  %s293_s11 = int_to_ptr.vmem [resolvable:$true] %s292_s11 }
  0x4d   :  { %v359_v10 = vpack.c.bf16 %v86_v8, %v84_v7  ;;  %v88_v13 = vld [vmem:[#allocation7 + $0x48] sm:$0xff]  ;;  %356 = vmatprep.subr.bf16.mxu0 %v355_v5  ;;  %v90_v14 = vld [vmem:[#allocation7 + $0x58] sm:$0xff]  ;;  %v361_v15 = vpack.c.bf16 %v85_v12, %v83_v11  ;;  %v87_v17 = vld [vmem:[#allocation7 + $0x40] sm:$0xff]  ;;  %s517_s12 = scalar_lea.vmem %s293_s11, 128  ;;  %p522_p5 = scmp.lt.s32.totalorder %s293_s11, %s293_s11 }
  0x4e   :  { %358 = vmatpush1.bf16.msra.mxu0 %v357_v9  ;;  %v363_v16 = vpack.c.bf16 %v90_v14, %v88_v13  ;;  %v89_v18 = vld [vmem:[#allocation7 + $0x50] sm:$0xff]  ;;  %v92_v19 = vld [vmem:[#allocation7 + $0x68] sm:$0xff]  ;;  %v94_v20 = vld [vmem:[#allocation7 + $0x78] sm:$0xff]  ;;  %p518_p4 = scmp.ne.s32.totalorder %s293_s11, %s517_s12  ;;  %p523_p6 = scmp.lt.s32.totalorder %s517_s12, %s517_s12 }
  0x4f   :  { %360 = vmatprep.subr.bf16.mxu0 %v359_v10  ;;  %v365_v21 = vpack.c.bf16 %v89_v18, %v87_v17  ;;  %v367_v22 = vpack.c.bf16 %v94_v20, %v92_v19  ;;  %v91_v23 = vld [vmem:[#allocation7 + $0x60] sm:$0xff]  ;;  %v93_v24 = vld [vmem:[#allocation7 + $0x70] sm:$0xff]  ;;  %v96_v25 = vld [vmem:[#allocation7 + $0x88] sm:$0xff] }
  0x50   :  { %v98_v26 = vld [vmem:[#allocation7 + $0x98] sm:$0xff]  ;;  %v193_v27 = vld [vmem:[#allocation8] sm:$0xff]  ;;  %v194_v28 = vld [vmem:[#allocation8 + $0x8] sm:$0xff]  ;;  %v369_v30 = vpack.c.bf16 %v93_v24, %v91_v23  ;;  %p524_p7 = por %p523_p6, %p522_p5 }
  0x51   :  { %v195_v29 = vld [vmem:[#allocation8 + $0x10] sm:$0xff]  ;;  %v388_v31 = vpack.c.bf16 %v194_v28, %v193_v27  ;;  %v196_v32 = vld [vmem:[#allocation8 + $0x18] sm:$0xff]  ;;  %v371_v33 = vpack.c.bf16 %v98_v26, %v96_v25  ;;  %v95_v34 = vld [vmem:[#allocation7 + $0x80] sm:$0xff] }
  0x52   :  { %362 = vmatpush1.bf16.msra.mxu0 %v361_v15  ;;  %v97_v35 = vld [vmem:[#allocation7 + $0x90] sm:$0xff]  ;;  %v100_v36 = vld [vmem:[#allocation7 + $0xa8] sm:$0xff]  ;;  %v102_v37 = vld [vmem:[#allocation7 + $0xb8] sm:$0xff]  ;;  %v391_v38 = vpack.c.bf16 %v196_v32, %v195_v29  ;;  %p525_p8 = pnand %p524_p7, %p518_p4 }
  0x53   :  { %364 = vmatprep.subr.bf16.mxu0 %v363_v16  ;;  %389 = vmatpush3.bf16.msra.mxu1 %v388_v31  ;;  %v197_v39 = vld [vmem:[#allocation8 + $0x20] sm:$0xff]  ;;  %v198_v40 = vld [vmem:[#allocation8 + $0x28] sm:$0xff]  ;;  %v373_v41 = vpack.c.bf16 %v97_v35, %v95_v34  ;;  %v375_v42 = vpack.c.bf16 %v102_v37, %v100_v36  ;;  %v101_v44 = vld [vmem:[#allocation7 + $0xb0] sm:$0xff] }
  0x54   :  { %390 = vmatprep.subr.bf16.mxu1 %v556_v1  ;;  %v99_v43 = vld [vmem:[#allocation7 + $0xa0] sm:$0xff]  ;;  %v104_v45 = vld [vmem:[#allocation7 + $0xc8] sm:$0xff]  ;;  %v106_v46 = vld [vmem:[#allocation7 + $0xd8] sm:$0xff]  ;;  %v394_v47 = vpack.c.bf16 %v198_v40, %v197_v39 }
  0x55   :  { %v377_v48 = vpack.c.bf16 %v101_v44, %v99_v43  ;;  %v379_v49 = vpack.c.bf16 %v106_v46, %v104_v45  ;;  %v103_v50 = vld [vmem:[#allocation7 + $0xc0] sm:$0xff]  ;;  %v105_v51 = vld [vmem:[#allocation7 + $0xd0] sm:$0xff]  ;;  %v108_v52 = vld [vmem:[#allocation7 + $0xe8] sm:$0xff] }
  0x56   :  { %366 = vmatpush1.bf16.msra.mxu0 %v365_v21  ;;  %v110_v53 = vld [vmem:[#allocation7 + $0xf8] sm:$0xff]  ;;  %v381_v54 = vpack.c.bf16 %v105_v51, %v103_v50  ;;  %v107_v56 = vld [vmem:[#allocation7 + $0xe0] sm:$0xff]  ;;  %v109_v57 = vld [vmem:[#allocation7 + $0xf0] sm:$0xff] }
  0x57   :  { %368 = vmatprep.subr.bf16.mxu0 %v367_v22  ;;  %392 = vmatpush3.bf16.msra.mxu1 %v391_v38  ;;  %v383_v55 = vpack.c.bf16 %v110_v53, %v108_v52  ;;  %v385_v58 = vpack.c.bf16 %v109_v57, %v107_v56  ;;  %v73_v59 = vld [vmem:[#allocation5] sm:$0xff]  ;;  %v199_v60 = vld [vmem:[#allocation8 + $0x30] sm:$0xff]  ;;  %v201_v63 = vld [vmem:[#allocation8 + $0x40] sm:$0xff] }
  0x58   :  { %393 = vmatprep.subr.bf16.mxu1 %v556_v1  ;;  %v200_v61 = vld [vmem:[#allocation8 + $0x38] sm:$0xff]  ;;  %v202_v2 = vld [vmem:[#allocation8 + $0x48] sm:$0xff]  ;;  %v203_v4 = vld [vmem:[#allocation8 + $0x50] sm:$0xff] }
  0x59   :  { %v397_v62 = vpack.c.bf16 %v200_v61, %v199_v60  ;;  %v400_v3 = vpack.c.bf16 %v202_v2, %v201_v63  ;;  %v204_v5 = vld [vmem:[#allocation8 + $0x58] sm:$0xff]  ;;  %v205_v7 = vld [vmem:[#allocation8 + $0x60] sm:$0xff]  ;;  %v206_v8 = vld [vmem:[#allocation8 + $0x68] sm:$0xff] }
  0x5a   :  { %370 = vmatpush1.bf16.msra.mxu0 %v369_v30  ;;  %v403_v6 = vpack.c.bf16 %v204_v5, %v203_v4  ;;  %v406_v9 = vpack.c.bf16 %v206_v8, %v205_v7  ;;  %v207_v10 = vld [vmem:[#allocation8 + $0x70] sm:$0xff]  ;;  %v208_v11 = vld [vmem:[#allocation8 + $0x78] sm:$0xff]  ;;  %v76_v13 = vld [vmem:[#allocation2] sm:$0xff] }
  0x5b   :  { %372 = vmatprep.subr.bf16.mxu0 %v371_v33  ;;  %395 = vmatpush3.bf16.msra.mxu1 %v394_v47  ;;  %v409_v12 = vpack.c.bf16 %v208_v11, %v207_v10  ;;  %v77_v22 = vld [vmem:[#allocation2 + $0x8] sm:$0xff]  ;;  %v78_v24 = vld [vmem:[#allocation2 + $0x10] sm:$0xff] }
  0x5c   :  { %396 = vmatprep.subr.bf16.mxu1 %v556_v1 }
  0x5e   :  { %374 = vmatpush1.bf16.msra.mxu0 %v373_v41 }
  0x5f   :  { %376 = vmatprep.subr.bf16.mxu0 %v375_v42  ;;  %398 = vmatpush3.bf16.msra.mxu1 %v397_v62 }
  0x60   :  { %399 = vmatprep.subr.bf16.mxu1 %v556_v1 }
  0x62   :  { %378 = vmatpush1.bf16.msra.mxu0 %v377_v48 }
  0x63   :  { %380 = vmatprep.subr.bf16.mxu0 %v379_v49  ;;  %401 = vmatpush3.bf16.msra.mxu1 %v400_v3 }
  0x64   :  { %402 = vmatprep.subr.bf16.mxu1 %v556_v1 }
  0x66   :  { %382 = vmatpush1.bf16.msra.mxu0 %v381_v54 }
  0x67   :  { %384 = vmatprep.subr.bf16.mxu0 %v383_v55  ;;  %404 = vmatpush3.bf16.msra.mxu1 %v403_v6 }
  0x68   :  { %405 = vmatprep.subr.bf16.mxu1 %v556_v1 }
  0x6a   :  { %386 = vmatpush1.bf16.msra.mxu0 %v385_v58 }
  0x6b   :  { %407 = vmatpush3.bf16.msra.mxu1 %v406_v9 }
  0x6c   :  { %408 = vmatprep.subr.bf16.mxu1 %v556_v1 }
  0x6d   :  { %176 = vmatmul.mubr.f32.vlgmr.msra.gmra.mrb[0].mxu0 %v73_v59 }
  0x6f   :  { %410 = vmatpush3.bf16.msra.mxu1 %v409_v12 }
 0x140   :  { %v177_v14 = vpop.f32.mrb[0].mxu0 }
 0x141   :  { %v182_v15 = vadd.f32 %v177_v14, %v76_v13  ;;  %v179_v16 = vpop.f32.mrb[1].mxu0 }
 0x142   :  { %v183_v1 = vadd.f32 %v179_v16, %v77_v22 }
 0x143   :  { %v184_v17 = vmul.f32 0.5, %v182_v15 }
 0x144   :  { %v188_v23 = vmul.f32 0.5, %v183_v1 }
 0x145   :  { %423 = vtanh.f32 %v184_v17 }
 0x146   :  { %425 = vtanh.f32 %v188_v23 }
 0x14f   :  { %v424_v18 = vpop.eup %423 }
 0x150   :  { %v186_v19 = vadd.f32 1.0, %v424_v18  ;;  %v426_v26 = vpop.eup %425 }
 0x151   :  { %v190_v28 = vadd.f32 1.0, %v426_v26 }
 0x152   :  { %v187_v20 = vmul.f32 0.5, %v186_v19 }
 0x153   :  { %v191_v29 = vmul.f32 0.5, %v190_v28 }
 0x154   :  { %v192_v21 = vmul.f32 %v187_v20, %v73_v59 }
 0x155   :  { %v282_v30 = vsub.f32 1.0, %v191_v29  ;;  %v281_v32 = vmul.f32 %v191_v29, %v73_v59 }
 0x156   :  { %353 = vmatmul.mubr.f32.vlgmr.msra.gmra.mrb[0].mxu1 %v192_v21 }
 0x229   :  { %v275_v25 = vpop.f32.mrb[0].mxu1 }
 0x22a   :  { %v279_v27 = vadd.f32 %v275_v25, %v78_v24  ;;  %v354_v0 = vpop.f32.mrb[1].mxu1 }
 0x22c   :  { %427 = vtanh.f32 %v279_v27 }
 0x236   :  { %v428_v31 = vpop.eup %427 }
 0x237   :  { %v283_v33 = vmul.f32 %v428_v31, %v282_v30 }
 0x239   :  { %v284_v34 = vadd.f32 %v283_v33, %v281_v32 }
 0x23b   :  { %285 = vst [vmem:[#allocation10] sm:$0xff] %v284_v34 }
 0x23c   :  { %528 = shalt.err (!%p525_p8)
}
 0x23d   :  { %s529_s15 = scalar_lea.hbm %s658_s4, 128 }
 0x23e   :  { %p530_p9 = scmp.ne.s32.totalorder %s658_s4, %s529_s15  ;;  %p533_p10 = scmp.lt.u32.totalorder %s529_s15, %s658_s4 }
 0x240   :  { %p535_p11 = pnand %p533_p10, %p530_p9 }
 0x242   :  { %538 = shalt.err (!%p535_p11)
}
 0x243   :  { %295 = dma.vmem_to_hbm [thread:$0]  %s293_s11, 128, %s658_s4, [#allocation4]  }
 0x244   :  { %545 = dma.done.wait [#allocation4], 128  }
 0x245   :  { %546 = vsyncadd [#allocation4], 4294967168 }
 0x246   :  { %299 = vsyncpa [#allocation3], 1 }
 0x247   :  { %300 = vsyncpa [#allocation6], 1 }
 0x248   :  { %301 = vsyncpa [#allocation9], 1 }
 0x249   :  { %302 = vsyncpa [#allocation4], 1 }

</bundles_post_ra>
